<compile_context>
chip_gen: v7x
topology: tpu7x:2x2x1
jax: 0.10.0
libtpu: 0.0.40
codegen_flags: <defaults>
</compile_context>

<pallas_src>
import jax
import jax.numpy as jnp
from jax import lax
from jax.experimental import pallas as pl
from jax.experimental.pallas import tpu as pltpu

# ------------------------- model hyper-parameters (small) -------------------
B = 8          # batch size
S = 16         # sequence length
VOCAB = 128    # vocab size (lane-dense contraction dim)
H = 128        # bert hidden size (stand-in)
D = 128        # out_dim (512 in the original)
F_HECO = 64    # HeCo embed dim (Linear(64, 512) in the original)
N_NODES = 32   # number of HeCo node embeddings (>= (STEP+1)*B)
WEIGHT = 0.5   # params['weight']
STEP = 1       # exercises the data-dependent heco block selection


# --------------------------- fused kernel ------------------------------------
def fused_kernel(step_ref,                         # scalar prefetch (used by index_map)
                 tok_ref, emb_ref, w_enc_ref, w_lin_ref, biases_ref, heco_ref,
                 scores_ref, loss_ref):
    del step_ref  # only consumed by the heco index_map

    # ---- to_bert_input for ctxt+cand stacked: (2B, S) ----
    tok = tok_ref[...]                                        # (2B, S) int32
    nz = tok != 0
    mask = nz.astype(jnp.float32)                             # only needed for cnt
    tok_m = jnp.where(nz, tok, -1)                            # pads never match iota

    # masked embedding-sum via one-hot counts -> ONE bf16 MXU matmul, f32 acc
    vocab_iota = lax.broadcasted_iota(jnp.int32, (2 * B, S, VOCAB), 2)
    onehot = (tok_m[:, :, None] == vocab_iota).astype(jnp.float32)
    counts = jnp.sum(onehot, axis=1)                          # (2B, VOCAB), small ints
    pooled = jnp.dot(counts.astype(jnp.bfloat16), emb_ref[...],
                     preferred_element_type=jnp.float32)      # (2B, H) f32
    cnt = jnp.sum(mask, axis=1, keepdims=True)                # (2B, 1)
    pooled = pooled / jnp.maximum(cnt, 1.0)                   # masked mean pool (f32)

    b = biases_ref[...]                                       # (3, D) f32

    # per-encoder output linears (bf16 in, f32 acc)
    e_ctxt = jnp.dot(pooled[:B].astype(jnp.bfloat16), w_enc_ref[0],
                     preferred_element_type=jnp.float32) + b[0:1]     # (B, D)
    e_cand = jnp.dot(pooled[B:].astype(jnp.bfloat16), w_enc_ref[1],
                     preferred_element_type=jnp.float32) + b[1:2]     # (B, D)

    # final_embeds_batch_mapped = Linear(F -> D)(final_embeds_batch)
    mapped = jnp.dot(heco_ref[...].astype(jnp.bfloat16), w_lin_ref[...],
                     preferred_element_type=jnp.float32) + b[2:3]     # (B, D)

    # ONE stacked scoring matmul: [e_ctxt ; mapped] (2B,D) x e_cand^T (D,B)
    # contract dim 1 of both operands -> no XLU transpose of e_cand.
    left = jnp.concatenate([e_ctxt, mapped], axis=0).astype(jnp.bfloat16)
    dnums = (((1,), (1,)), ((), ()))
    both = lax.dot_general(left, e_cand.astype(jnp.bfloat16), dnums,
                           preferred_element_type=jnp.float32)        # (2B, B)

    scores = both[:B] + jnp.tanh(both[B:]) * WEIGHT           # f32 elementwise
    scores_ref[...] = scores

    # cross_entropy(scores, arange(B), reduction='mean')  (f32 throughout)
    m = jnp.max(scores, axis=1, keepdims=True)                        # (B, 1)
    lse = m + jnp.log(jnp.sum(jnp.exp(scores - m), axis=1, keepdims=True))
    row = lax.broadcasted_iota(jnp.int32, (B, B), 0)
    col = lax.broadcasted_iota(jnp.int32, (B, B), 1)
    diag = jnp.sum(jnp.where(row == col, scores, 0.0), axis=1, keepdims=True)
    loss_ref[0, 0] = jnp.sum(lse - diag) / B


# ------------------------------ full forward ---------------------------------
def biencoder_ranker_forward(context_input, cand_input, step, params):
    # pack / cast once in the wrapper: fewer inputs, bf16 MXU-ready weights
    tok_both = jnp.concatenate([context_input, cand_input], axis=0)        # (2B, S)
    emb_bf = params["emb_table"].astype(jnp.bfloat16)                      # (VOCAB, H)
    w_enc = jnp.stack([params["w_ctxt"], params["w_cand"]]).astype(jnp.bfloat16)  # (2,H,D)
    w_lin = params["w_lin"].astype(jnp.bfloat16)                           # (F, D)
    biases = jnp.concatenate([params["b_ctxt"], params["b_cand"],
                              params["b_lin"]], axis=0)                    # (3, D) f32
    final_embeds = params["final_embeds"]                                  # (N_NODES, F)

    # clamp like lax.dynamic_slice so the heco block DMA can never read OOB
    step_arr = jnp.clip(jnp.asarray([step], jnp.int32), 0, N_NODES // B - 1)

    flops = 2 * (2 * B * VOCAB * H        # stacked counts @ emb
                 + 2 * B * H * D          # two encoder output linears
                 + B * F_HECO * D         # heco mapping
                 + 2 * B * D * B)         # stacked scoring matmul
    bytes_accessed = (tok_both.size * 4 + emb_bf.size * 2 + w_enc.size * 2
                      + w_lin.size * 2 + biases.size * 4 + B * F_HECO * 4
                      + B * B * 4 + 8)

    scores, loss = pl.pallas_call(
        fused_kernel,
        out_shape=(
            jax.ShapeDtypeStruct((B, B), jnp.float32),
            jax.ShapeDtypeStruct((1, 1), jnp.float32),
        ),
        grid_spec=pltpu.PrefetchScalarGridSpec(
            num_scalar_prefetch=1,
            grid=(1,),
            in_specs=[
                pl.BlockSpec((2 * B, S), lambda i, s: (0, 0)),          # ctxt+cand tokens
                # TODO(synk): at real vocab use memory_space=pl.ANY + DMA gather
                pl.BlockSpec((VOCAB, H), lambda i, s: (0, 0)),          # emb table (bf16)
                pl.BlockSpec((2, H, D), lambda i, s: (0, 0, 0)),        # w_ctxt/w_cand
                pl.BlockSpec((F_HECO, D), lambda i, s: (0, 0)),         # w_lin
                pl.BlockSpec((3, D), lambda i, s: (0, 0)),              # stacked biases
                # final_embeds[step*B : step*B + B, :] folded into the block DMA
                pl.BlockSpec((B, F_HECO), lambda i, s: (s[0], 0)),      # heco block
            ],
            out_specs=(
                pl.BlockSpec((B, B), lambda i, s: (0, 0)),              # scores
                pl.BlockSpec(memory_space=pltpu.MemorySpace.SMEM),      # scalar loss
            ),
        ),
        compiler_params=pltpu.CompilerParams(
            dimension_semantics=("arbitrary",)),
        cost_estimate=pl.CostEstimate(
            flops=flops, transcendentals=2 * B * B + B,
            bytes_accessed=bytes_accessed),
    )(step_arr, tok_both, emb_bf, w_enc, w_lin, biases, final_embeds)

    return loss[0, 0], scores


# ------------------------- pure-JAX reference (for checking) -----------------
def reference_forward(context_input, cand_input, step, params):
    def enc(tok, w, b):
        nz = tok != 0
        tok = tok * nz.astype(tok.dtype)
        emb = params["emb_table"][tok]                       # (B, S, H)
        m = nz.astype(jnp.float32)
        pooled = jnp.sum(emb * m[:, :, None], axis=1)
        pooled = pooled / jnp.maximum(jnp.sum(m, axis=1, keepdims=True), 1.0)
        return pooled @ w + b

    e_ctxt = enc(context_input, params["w_ctxt"], params["b_ctxt"])
    e_cand = enc(cand_input, params["w_cand"], params["b_cand"])
    heco = lax.dynamic_slice(params["final_embeds"], (step * B, 0), (B, F_HECO))
    scores1 = e_ctxt @ e_cand.T
    mapped = heco @ params["w_lin"] + params["b_lin"]
    scores = scores1 + jnp.tanh(mapped @ e_cand.T) * WEIGHT
    m = jnp.max(scores, axis=1, keepdims=True)
    lse = m[:, 0] + jnp.log(jnp.sum(jnp.exp(scores - m), axis=1))
    loss = jnp.mean(lse - jnp.diagonal(scores))
    return loss, scores


# --------------------------------- main --------------------------------------
if __name__ == "__main__":
    key = jax.random.PRNGKey(0)
    keys = jax.random.split(key, 10)

    # deterministic synthetic parameters
    params = {
        "emb_table": jax.random.normal(keys[0], (VOCAB, H), jnp.float32) * 0.1,
        "w_ctxt": jax.random.normal(keys[1], (H, D), jnp.float32) * 0.1,
        "b_ctxt": jax.random.normal(keys[2], (1, D), jnp.float32) * 0.01,
        "w_cand": jax.random.normal(keys[3], (H, D), jnp.float32) * 0.1,
        "b_cand": jax.random.normal(keys[4], (1, D), jnp.float32) * 0.01,
        "w_lin": jax.random.normal(keys[5], (F_HECO, D), jnp.float32) * 0.1,
        "b_lin": jax.random.normal(keys[6], (1, D), jnp.float32) * 0.01,
        "final_embeds": jax.random.normal(keys[7], (N_NODES, F_HECO),
                                          jnp.float32),
    }

    # deterministic synthetic token ids + explicit NULL_IDX (=0) padding tail
    context_input = jax.random.randint(keys[8], (B, S), 1, VOCAB, jnp.int32)
    cand_input = jax.random.randint(keys[9], (B, S), 1, VOCAB, jnp.int32)
    context_input = context_input.at[:, S - 3:].set(0)
    cand_input = cand_input.at[:, S - 2:].set(0)

    loss, scores = biencoder_ranker_forward(context_input, cand_input,
                                            STEP, params)
    jax.block_until_ready((loss, scores))

    # sanity check against the pure-JAX f32 reference (kernel uses bf16 MXU inputs)
    ref_loss, ref_scores = reference_forward(context_input, cand_input,
                                             STEP, params)
    assert scores.shape == (B, B) and loss.shape == ()
    assert jnp.allclose(scores, ref_scores, rtol=1e-2, atol=1e-2), \
        float(jnp.max(jnp.abs(scores - ref_scores)))
    assert jnp.allclose(loss, ref_loss, rtol=1e-2, atol=1e-2)
    print("KERNEL_OK")
</pallas_src>

<mosaic_0001>
module attributes {stable_mosaic.version = 11 : i64} {
  func.func @fused_kernel(%arg0: i32, %arg1: memref<1xi32, #tpu.memory_space<smem>>, %arg2: memref<16x16xi32, #tpu.memory_space<vmem>>, %arg3: memref<128x128xbf16, #tpu.memory_space<vmem>>, %arg4: memref<2x128x128xbf16, #tpu.memory_space<vmem>>, %arg5: memref<64x128xbf16, #tpu.memory_space<vmem>>, %arg6: memref<3x128xf32, #tpu.memory_space<vmem>>, %arg7: memref<8x64xf32, #tpu.memory_space<vmem>>, %arg8: memref<8x8xf32, #tpu.memory_space<vmem>>, %arg9: memref<1x1xf32, #tpu.memory_space<smem>>) attributes {dimension_semantics = [#tpu.dimension_semantics<arbitrary>], iteration_bounds = array<i64: 1>, scalar_prefetch = 1 : i64, scratch_operands = 0 : i64, tpu.core_type = #tpu.core_type<tc>, window_params = [{pipeline_mode = #tpu.pipeline_mode<synchronous>, transform_indices = @transform_0, window_bounds = array<i64: 16, 16>}, {pipeline_mode = #tpu.pipeline_mode<synchronous>, transform_indices = @transform_1, window_bounds = array<i64: 128, 128>}, {pipeline_mode = #tpu.pipeline_mode<synchronous>, transform_indices = @transform_2, window_bounds = array<i64: 2, 128, 128>}, {pipeline_mode = #tpu.pipeline_mode<synchronous>, transform_indices = @transform_3, window_bounds = array<i64: 64, 128>}, {pipeline_mode = #tpu.pipeline_mode<synchronous>, transform_indices = @transform_4, window_bounds = array<i64: 3, 128>}, {transform_indices = @transform_5, window_bounds = array<i64: 8, 64>}, {pipeline_mode = #tpu.pipeline_mode<synchronous>, transform_indices = @transform_6, window_bounds = array<i64: 8, 8>}, {transform_indices = @transform_7, window_bounds = array<i64: 1, 1>}]} {
    %c0 = arith.constant 0 : index
    %c0_0 = arith.constant 0 : index
    %0 = vector.load %arg2[%c0, %c0_0] : memref<16x16xi32, #tpu.memory_space<vmem>>, vector<16x16xi32>
    %c0_i32 = arith.constant 0 : i32
    %1 = vector.broadcast %c0_i32 : i32 to vector<16x16xi32>
    %2 = arith.cmpi ne, %0, %1 : vector<16x16xi32>
    %3 = arith.extui %2 : vector<16x16xi1> to vector<16x16xi32>
    %4 = arith.sitofp %3 : vector<16x16xi32> to vector<16x16xf32>
    %c-1_i32 = arith.constant -1 : i32
    %5 = vector.broadcast %c-1_i32 : i32 to vector<16x16xi32>
    %6 = arith.select %2, %0, %5 : vector<16x16xi1>, vector<16x16xi32>
    %7 = tpu.iota {dimensions = array<i32: 2>} : vector<16x16x128xi32>
    %8 = vector.shape_cast %6 : vector<16x16xi32> to vector<16x16x1xi32>
    %9 = vector.broadcast %8 : vector<16x16x1xi32> to vector<16x16x128xi32>
    %10 = arith.cmpi eq, %9, %7 : vector<16x16x128xi32>
    %11 = arith.extui %10 : vector<16x16x128xi1> to vector<16x16x128xi32>
    %12 = arith.sitofp %11 : vector<16x16x128xi32> to vector<16x16x128xf32>
    %cst = arith.constant dense<0.000000e+00> : vector<16x128xf32>
    %13 = vector.multi_reduction <add>, %12, %cst [1] : vector<16x16x128xf32> to vector<16x128xf32>
    %14 = arith.truncf %13 : vector<16x128xf32> to vector<16x128xbf16>
    %c0_1 = arith.constant 0 : index
    %c0_2 = arith.constant 0 : index
    %15 = vector.load %arg3[%c0_1, %c0_2] : memref<128x128xbf16, #tpu.memory_space<vmem>>, vector<128x128xbf16>
    %cst_3 = arith.constant dense<0.000000e+00> : vector<16x128xf32>
    %16 = tpu.matmul %14, %15, %cst_3 {dimension_numbers = #tpu.dot_dimension_numbers<[1], [0], [0], [1], [0, 0, 1, 1], [], []>} : vector<16x128xbf16>, vector<128x128xbf16>, vector<16x128xf32> -> vector<16x128xf32>
    %cst_4 = arith.constant dense<0.000000e+00> : vector<16xf32>
    %17 = vector.multi_reduction <add>, %4, %cst_4 [1] : vector<16x16xf32> to vector<16xf32>
    %18 = vector.shape_cast %17 : vector<16xf32> to vector<16x1xf32>
    %cst_5 = arith.constant 1.000000e+00 : f32
    %19 = vector.broadcast %cst_5 : f32 to vector<16x1xf32>
    %20 = arith.maximumf %18, %19 : vector<16x1xf32>
    %21 = vector.broadcast %20 : vector<16x1xf32> to vector<16x128xf32>
    %22 = arith.divf %16, %21 : vector<16x128xf32>
    %c0_6 = arith.constant 0 : index
    %c0_7 = arith.constant 0 : index
    %23 = vector.load %arg6[%c0_6, %c0_7] : memref<3x128xf32, #tpu.memory_space<vmem>>, vector<3x128xf32>
    %24 = vector.extract_strided_slice %22 {offsets = [0, 0], sizes = [8, 128], strides = [1, 1]} : vector<16x128xf32> to vector<8x128xf32>
    %25 = arith.truncf %24 : vector<8x128xf32> to vector<8x128xbf16>
    %c0_8 = arith.constant 0 : index
    %c0_9 = arith.constant 0 : index
    %c0_10 = arith.constant 0 : index
    %26 = vector.load %arg4[%c0_8, %c0_9, %c0_10] : memref<2x128x128xbf16, #tpu.memory_space<vmem>>, vector<1x128x128xbf16>
    %27 = vector.shape_cast %26 : vector<1x128x128xbf16> to vector<128x128xbf16>
    %cst_11 = arith.constant dense<0.000000e+00> : vector<8x128xf32>
    %28 = tpu.matmul %25, %27, %cst_11 {dimension_numbers = #tpu.dot_dimension_numbers<[1], [0], [0], [1], [0, 0, 1, 1], [], []>} : vector<8x128xbf16>, vector<128x128xbf16>, vector<8x128xf32> -> vector<8x128xf32>
    %29 = vector.extract_strided_slice %23 {offsets = [0, 0], sizes = [1, 128], strides = [1, 1]} : vector<3x128xf32> to vector<1x128xf32>
    %30 = vector.broadcast %29 : vector<1x128xf32> to vector<8x128xf32>
    %31 = arith.addf %28, %30 : vector<8x128xf32>
    %32 = vector.extract_strided_slice %22 {offsets = [8, 0], sizes = [8, 128], strides = [1, 1]} : vector<16x128xf32> to vector<8x128xf32>
    %33 = arith.truncf %32 : vector<8x128xf32> to vector<8x128xbf16>
    %c1 = arith.constant 1 : index
    %c0_12 = arith.constant 0 : index
    %c0_13 = arith.constant 0 : index
    %34 = vector.load %arg4[%c1, %c0_12, %c0_13] : memref<2x128x128xbf16, #tpu.memory_space<vmem>>, vector<1x128x128xbf16>
    %35 = vector.shape_cast %34 : vector<1x128x128xbf16> to vector<128x128xbf16>
    %cst_14 = arith.constant dense<0.000000e+00> : vector<8x128xf32>
    %36 = tpu.matmul %33, %35, %cst_14 {dimension_numbers = #tpu.dot_dimension_numbers<[1], [0], [0], [1], [0, 0, 1, 1], [], []>} : vector<8x128xbf16>, vector<128x128xbf16>, vector<8x128xf32> -> vector<8x128xf32>
    %37 = vector.extract_strided_slice %23 {offsets = [1, 0], sizes = [1, 128], strides = [1, 1]} : vector<3x128xf32> to vector<1x128xf32>
    %38 = vector.broadcast %37 : vector<1x128xf32> to vector<8x128xf32>
    %39 = arith.addf %36, %38 : vector<8x128xf32>
    %c0_15 = arith.constant 0 : index
    %c0_16 = arith.constant 0 : index
    %40 = vector.load %arg7[%c0_15, %c0_16] : memref<8x64xf32, #tpu.memory_space<vmem>>, vector<8x64xf32>
    %41 = arith.truncf %40 : vector<8x64xf32> to vector<8x64xbf16>
    %c0_17 = arith.constant 0 : index
    %c0_18 = arith.constant 0 : index
    %42 = vector.load %arg5[%c0_17, %c0_18] : memref<64x128xbf16, #tpu.memory_space<vmem>>, vector<64x128xbf16>
    %cst_19 = arith.constant dense<0.000000e+00> : vector<8x128xf32>
    %43 = tpu.matmul %41, %42, %cst_19 {dimension_numbers = #tpu.dot_dimension_numbers<[1], [0], [0], [1], [0, 0, 1, 1], [], []>} : vector<8x64xbf16>, vector<64x128xbf16>, vector<8x128xf32> -> vector<8x128xf32>
    %44 = vector.extract_strided_slice %23 {offsets = [2, 0], sizes = [1, 128], strides = [1, 1]} : vector<3x128xf32> to vector<1x128xf32>
    %45 = vector.broadcast %44 : vector<1x128xf32> to vector<8x128xf32>
    %46 = arith.addf %43, %45 : vector<8x128xf32>
    %47 = tpu.concatenate %31, %46 in 0 : vector<8x128xf32>, vector<8x128xf32> -> vector<16x128xf32>
    %48 = arith.truncf %47 : vector<16x128xf32> to vector<16x128xbf16>
    %49 = arith.truncf %39 : vector<8x128xf32> to vector<8x128xbf16>
    %cst_20 = arith.constant dense<0.000000e+00> : vector<16x8xf32>
    %50 = tpu.matmul %48, %49, %cst_20 {dimension_numbers = #tpu.dot_dimension_numbers<[1], [1], [0], [0], [0, 0, 1, 0], [], []>} : vector<16x128xbf16>, vector<8x128xbf16>, vector<16x8xf32> -> vector<16x8xf32>
    %51 = vector.extract_strided_slice %50 {offsets = [0, 0], sizes = [8, 8], strides = [1, 1]} : vector<16x8xf32> to vector<8x8xf32>
    %52 = vector.extract_strided_slice %50 {offsets = [8, 0], sizes = [8, 8], strides = [1, 1]} : vector<16x8xf32> to vector<8x8xf32>
    %53 = math.tanh %52 : vector<8x8xf32>
    %cst_21 = arith.constant 5.000000e-01 : f32
    %54 = vector.broadcast %cst_21 : f32 to vector<8x8xf32>
    %55 = arith.mulf %53, %54 : vector<8x8xf32>
    %56 = arith.addf %51, %55 : vector<8x8xf32>
    %c0_22 = arith.constant 0 : index
    %c0_23 = arith.constant 0 : index
    %57 = vector.load %arg8[%c0_22, %c0_23] : memref<8x8xf32, #tpu.memory_space<vmem>>, vector<8x8xf32>
    tpu.vector_store %arg8[%c0_22, %c0_23], %56 {strides = array<i32>} : memref<8x8xf32, #tpu.memory_space<vmem>>, vector<8x8xf32>,
    %cst_24 = arith.constant dense<0xFF800000> : vector<8xf32>
    %58 = vector.multi_reduction <maximumf>, %56, %cst_24 [1] : vector<8x8xf32> to vector<8xf32>
    %59 = vector.shape_cast %58 : vector<8xf32> to vector<8x1xf32>
    %60 = vector.broadcast %59 : vector<8x1xf32> to vector<8x8xf32>
    %61 = arith.subf %56, %60 : vector<8x8xf32>
    %62 = math.exp %61 : vector<8x8xf32>
    %cst_25 = arith.constant dense<0.000000e+00> : vector<8xf32>
    %63 = vector.multi_reduction <add>, %62, %cst_25 [1] : vector<8x8xf32> to vector<8xf32>
    %64 = vector.shape_cast %63 : vector<8xf32> to vector<8x1xf32>
    %65 = math.log %64 : vector<8x1xf32>
    %66 = arith.addf %59, %65 : vector<8x1xf32>
    %67 = tpu.iota {dimensions = array<i32: 0>} : vector<8x8xi32>
    %68 = tpu.iota {dimensions = array<i32: 1>} : vector<8x8xi32>
    %69 = arith.cmpi eq, %67, %68 : vector<8x8xi32>
    %cst_26 = arith.constant 0.000000e+00 : f32
    %70 = vector.broadcast %cst_26 : f32 to vector<8x8xf32>
    %71 = arith.select %69, %56, %70 : vector<8x8xi1>, vector<8x8xf32>
    %cst_27 = arith.constant dense<0.000000e+00> : vector<8xf32>
    %72 = vector.multi_reduction <add>, %71, %cst_27 [1] : vector<8x8xf32> to vector<8xf32>
    %73 = vector.shape_cast %72 : vector<8xf32> to vector<8x1xf32>
    %74 = arith.subf %66, %73 : vector<8x1xf32>
    %75 = vector.shape_cast %74 : vector<8x1xf32> to vector<1x8x1xf32>
    %cst_28 = arith.constant dense<0.000000e+00> : vector<1xf32>
    %76 = vector.multi_reduction <add>, %75, %cst_28 [1, 2] : vector<1x8x1xf32> to vector<1xf32>
    %77 = vector.shape_cast %76 : vector<1xf32> to vector<1x1x1xf32>
    %78 = vector.extract %77[0, 0, 0] : f32 from vector<1x1x1xf32>
    %cst_29 = arith.constant 8.000000e+00 : f32
    %79 = arith.divf %78, %cst_29 : f32
    %c0_30 = arith.constant 0 : index
    %c0_31 = arith.constant 0 : index
    %80 = memref.load %arg9[%c0_30, %c0_31] : memref<1x1xf32, #tpu.memory_space<smem>>
    memref.store %79, %arg9[%c0_30, %c0_31] : memref<1x1xf32, #tpu.memory_space<smem>>
    return
  }
  func.func @transform_0(%arg0: i32, %arg1: memref<1xi32, #tpu.memory_space<smem>>) -> (i32, i32) {
    %c0_i32 = arith.constant 0 : i32
    %c0_i32_0 = arith.constant 0 : i32
    %c0_i32_1 = arith.constant 0 : i32
    return %c0_i32, %c0_i32_0 : i32, i32
  }
  func.func @transform_1(%arg0: i32, %arg1: memref<1xi32, #tpu.memory_space<smem>>) -> (i32, i32) {
    %c0_i32 = arith.constant 0 : i32
    %c0_i32_0 = arith.constant 0 : i32
    %c0_i32_1 = arith.constant 0 : i32
    return %c0_i32, %c0_i32_0 : i32, i32
  }
  func.func @transform_2(%arg0: i32, %arg1: memref<1xi32, #tpu.memory_space<smem>>) -> (i32, i32, i32) {
    %c0_i32 = arith.constant 0 : i32
    %c0_i32_0 = arith.constant 0 : i32
    %c0_i32_1 = arith.constant 0 : i32
    %c0_i32_2 = arith.constant 0 : i32
    return %c0_i32, %c0_i32_0, %c0_i32_1 : i32, i32, i32
  }
  func.func @transform_3(%arg0: i32, %arg1: memref<1xi32, #tpu.memory_space<smem>>) -> (i32, i32) {
    %c0_i32 = arith.constant 0 : i32
    %c0_i32_0 = arith.constant 0 : i32
    %c0_i32_1 = arith.constant 0 : i32
    return %c0_i32, %c0_i32_0 : i32, i32
  }
  func.func @transform_4(%arg0: i32, %arg1: memref<1xi32, #tpu.memory_space<smem>>) -> (i32, i32) {
    %c0_i32 = arith.constant 0 : i32
    %c0_i32_0 = arith.constant 0 : i32
    %c0_i32_1 = arith.constant 0 : i32
    return %c0_i32, %c0_i32_0 : i32, i32
  }
  func.func @transform_5(%arg0: i32, %arg1: memref<1xi32, #tpu.memory_space<smem>>) -> (i32, i32) {
    %c0 = arith.constant 0 : index
    %0 = memref.load %arg1[%c0] : memref<1xi32, #tpu.memory_space<smem>>
    %c0_i32 = arith.constant 0 : i32
    %c0_i32_0 = arith.constant 0 : i32
    return %0, %c0_i32 : i32, i32
  }
  func.func @transform_6(%arg0: i32, %arg1: memref<1xi32, #tpu.memory_space<smem>>) -> (i32, i32) {
    %c0_i32 = arith.constant 0 : i32
    %c0_i32_0 = arith.constant 0 : i32
    %c0_i32_1 = arith.constant 0 : i32
    return %c0_i32, %c0_i32_0 : i32, i32
  }
  func.func @transform_7(%arg0: i32, %arg1: memref<1xi32, #tpu.memory_space<smem>>) -> (i32, i32) {
    %c0_i32 = arith.constant 0 : i32
    %c0_i32_0 = arith.constant 0 : i32
    %c0_i32_1 = arith.constant 0 : i32
    return %c0_i32, %c0_i32_0 : i32, i32
  }
}

</mosaic_0001>

<bundles_post_ra>
// kernel: tpu_custom_call.1
= control target key start
LH: loop header
LB: loop body
LE: loop exit
PB: predicated region body
PF: predicated region fallthrough
CT: control target
= control target key end

     0   :  { %15 = vsyncpa [#allocation5], 0  ;;  %s1828_s0 = inlined_call_operand.<no memory space> [shape: s32[1], index: 0, kind: input, shape index: {}]   ;;  %s1829_s1 = inlined_call_operand.hbm [shape: s32[16,16], index: 1, kind: input, shape index: {}]   ;;  %s1830_s2 = inlined_call_operand.hbm [shape: bf16[128,128], index: 2, kind: input, shape index: {}]   ;;  %s1831_s3 = inlined_call_operand.hbm [shape: bf16[2,128,128], index: 3, kind: input, shape index: {}]   ;;  %s1832_s4 = inlined_call_operand.hbm [shape: bf16[64,128], index: 4, kind: input, shape index: {}]   ;;  %s1833_s5 = inlined_call_operand.vmem [shape: f32[3,128], index: 5, kind: input, shape index: {}]   ;;  %s1834_s6 = inlined_call_operand.hbm [shape: f32[32,64], index: 6, kind: input, shape index: {}]   ;;  %s1835_s7 = inlined_call_operand.hbm [shape: f32[8,8], index: 7, kind: output, shape index: {0}]   ;;  %s1836_s8 = inlined_call_operand.hbm [shape: f32[1,1], index: 8, kind: output, shape index: {1}]  }
   0x1   :  { %16 = vsyncpa [#allocation9], 0 }
   0x2   :  { %17 = vsyncpa [#allocation12], 0 }
   0x3   :  { %18 = vsyncpa [#allocation6], 0 }
   0x4   :  { %19 = vsyncpa [#allocation7], 0  ;;  %s1486_s27 = smov [#allocation8]   ;;  %s1332_s9 = scalar_lea.hbm %s1830_s2, 1024 }
   0x5   :  { %s37_s28 = sshll.u32 %s1486_s27, 4  ;;  %p1333_p0 = scmp.ne.s32.totalorder %s1830_s2, %s1332_s9  ;;  %s38_s28 = int_to_ptr.vmem [resolvable:$true] %s37_s28 }
   0x6   :  { %p1336_p1 = scmp.lt.u32.totalorder %s1332_s9, %s1830_s2 }
   0x8   :  { %p1338_p2 = pnand %p1336_p1, %p1333_p0 }
   0xa   :  { %1341 = shalt.err (!%p1338_p2)
}
   0xb   :  { %s1342_s14 = scalar_lea.vmem %s38_s28, 1024  ;;  %p1347_p4 = scmp.lt.s32.totalorder %s38_s28, %s38_s28 }
   0xc   :  { %p1343_p3 = scmp.ne.s32.totalorder %s38_s28, %s1342_s14  ;;  %p1348_p5 = scmp.lt.s32.totalorder %s1342_s14, %s1342_s14 }
   0xe   :  { %p1349_p6 = por %p1348_p5, %p1347_p4 }
  0x10   :  { %p1350_p7 = pnand %p1349_p6, %p1343_p3 }
  0x12   :  { %1353 = shalt.err (!%p1350_p7)
}
  0x13   :  { %s1487_s15 = smov 64   ;;  %s1488_s16 = smov 4  }
  0x14   :  { %43 = dma.hbm_to_vmem [thread:$0]  %s1830_s2, 1024, %s38_s28, [#allocation9], %s1487_s15, %s1487_s15, %s1488_s16  }
  0x15   :  { %s1489_s19 = smov [#allocation11]   ;;  %s1490_s21 = smov [#allocation4]  }
  0x16   :  { %s61_s20 = sshll.u32 %s1489_s19, 4  ;;  %s25_s22 = sshll.u32 %s1490_s21, 4  ;;  %s62_s20 = int_to_ptr.vmem [resolvable:$true] %s61_s20  ;;  %s26_s22 = int_to_ptr.vmem [resolvable:$true] %s25_s22 }
  0x17   :  { %s1354_s25 = scalar_lea.hbm %s1832_s4, 512 }
  0x18   :  { %p1355_p8 = scmp.ne.s32.totalorder %s1832_s4, %s1354_s25  ;;  %p1358_p9 = scmp.lt.u32.totalorder %s1354_s25, %s1832_s4 }
  0x1a   :  { %p1360_p10 = pnand %p1358_p9, %p1355_p8 }
  0x1c   :  { %1363 = shalt.err (!%p1360_p10)
}
  0x1d   :  { %s1364_s2 = scalar_lea.vmem %s62_s20, 512  ;;  %p1369_p12 = scmp.lt.s32.totalorder %s62_s20, %s62_s20 }
  0x1e   :  { %p1365_p11 = scmp.ne.s32.totalorder %s62_s20, %s1364_s2  ;;  %p1370_p13 = scmp.lt.s32.totalorder %s1364_s2, %s1364_s2 }
  0x20   :  { %p1371_p0 = por %p1370_p13, %p1369_p12 }
  0x22   :  { %p1372_p1 = pnand %p1371_p0, %p1365_p11 }
  0x24   :  { %1375 = shalt.err (!%p1372_p1)
}
  0x25   :  { %67 = dma.hbm_to_vmem [thread:$0]  %s1832_s4, 512, %s62_s20, [#allocation12], %s1487_s15, %s1487_s15, %s1488_s16  }
  0x26   :  { %s1376_s12 = scalar_lea.hbm %s1829_s1, 256 }
  0x27   :  { %p1377_p2 = scmp.ne.s32.totalorder %s1829_s1, %s1376_s12  ;;  %p1380_p3 = scmp.lt.u32.totalorder %s1376_s12, %s1829_s1 }
  0x29   :  { %p1382_p4 = pnand %p1380_p3, %p1377_p2 }
  0x2b   :  { %1385 = shalt.err (!%p1382_p4)
}
  0x2c   :  { %s1386_s19 = scalar_lea.vmem %s26_s22, 256  ;;  %p1391_p6 = scmp.lt.s32.totalorder %s26_s22, %s26_s22 }
  0x2d   :  { %p1387_p5 = scmp.ne.s32.totalorder %s26_s22, %s1386_s19  ;;  %p1392_p7 = scmp.lt.s32.totalorder %s1386_s19, %s1386_s19 }
  0x2f   :  { %p1393_p8 = por %p1392_p7, %p1391_p6 }
  0x31   :  { %p1394_p9 = pnand %p1393_p8, %p1387_p5 }
  0x33   :  { %1397 = shalt.err (!%p1394_p9)
}
  0x34   :  { %s1491_s4 = smov 128   ;;  %s1492_s20 = smov 8  }
  0x35   :  { %31 = dma.hbm_to_vmem [thread:$0]  %s1829_s1, 256, %s26_s22, [#allocation5], %s1491_s4, %s1491_s4, %s1492_s20  }
  0x36   :  { %s1493_s24 = smov [#allocation10]   ;;  %s1103_s29 = sshll.u32 %s1828_s0, 7 }
  0x37   :  { %s49_s25 = sshll.u32 %s1493_s24, 4  ;;  %s1398_s28 = scalar_lea.hbm %s1831_s3, 2048  ;;  %s50_s25 = int_to_ptr.vmem [resolvable:$true] %s49_s25 }
  0x38   :  { %p1399_p10 = scmp.ne.s32.totalorder %s1831_s3, %s1398_s28  ;;  %p1402_p11 = scmp.lt.u32.totalorder %s1398_s28, %s1831_s3 }
  0x3a   :  { %p1404_p12 = pnand %p1402_p11, %p1399_p10 }
  0x3c   :  { %1407 = shalt.err (!%p1404_p12)
}
  0x3d   :  { %s1408_s1 = scalar_lea.vmem %s50_s25, 2048  ;;  %p1413_p0 = scmp.lt.s32.totalorder %s50_s25, %s50_s25 }
  0x3e   :  { %p1409_p13 = scmp.ne.s32.totalorder %s50_s25, %s1408_s1  ;;  %p1414_p1 = scmp.lt.s32.totalorder %s1408_s1, %s1408_s1 }
  0x40   :  { %p1415_p2 = por %p1414_p1, %p1413_p0 }
  0x42   :  { %p1416_p3 = pnand %p1415_p2, %p1409_p13 }
  0x44   :  { %1419 = shalt.err (!%p1416_p3)
}
  0x45   :  { %55 = dma.hbm_to_vmem [thread:$0]  %s1831_s3, 2048, %s50_s25, [#allocation9], %s1487_s15, %s1487_s15, %s1488_s16  }
  0x46   :  { %s77_s17 = scalar_lea.hbm %s1834_s6, %s1103_s29  ;;  %s1494_s18 = smov [#allocation13]  }
  0x47   :  { %s79_s19 = sshll.u32 %s1494_s18, 4  ;;  %s1420_s4 = scalar_lea.hbm %s77_s17, 128  ;;  %s80_s19 = int_to_ptr.vmem [resolvable:$true] %s79_s19 }
  0x48   :  { %p1421_p4 = scmp.ne.s32.totalorder %s77_s17, %s1420_s4  ;;  %s1422_s23 = scalar_lea.hbm %s1834_s6, 512 }
  0x49   :  { %p1423_p5 = scmp.lt.u32.totalorder %s77_s17, %s1834_s6  ;;  %p1424_p6 = scmp.lt.u32.totalorder %s1422_s23, %s1420_s4 }
  0x4a   :  { %p1426_p8 = scmp.lt.u32.totalorder %s1420_s4, %s77_s17 }
  0x4b   :  { %p1425_p7 = por %p1424_p6, %p1423_p5 }
  0x4d   :  { %p1427_p9 = por %p1426_p8, %p1425_p7 }
  0x4f   :  { %p1428_p10 = pnand %p1427_p9, %p1421_p4 }
  0x51   :  { %1431 = shalt.err (!%p1428_p10)
}
  0x52   :  { %s1432_s3 = scalar_lea.vmem %s80_s19, 128  ;;  %p1437_p12 = scmp.lt.s32.totalorder %s80_s19, %s80_s19 }
  0x53   :  { %p1433_p11 = scmp.ne.s32.totalorder %s80_s19, %s1432_s3  ;;  %p1438_p13 = scmp.lt.s32.totalorder %s1432_s3, %s1432_s3 }
  0x55   :  { %p1439_p0 = por %p1438_p13, %p1437_p12 }
  0x57   :  { %p1440_p1 = pnand %p1439_p0, %p1433_p11 }
  0x59   :  { %1443 = shalt.err (!%p1440_p1)
}
  0x5a   :  { %82 = dma.hbm_to_vmem [thread:$0]  %s77_s17, 128, %s80_s19, [#allocation12]  }
  0x5b   :  { %1476 = dma.done.wait [#allocation5], 256  }
  0x5c   :  { %1477 = vsyncadd [#allocation5], 4294967040 }
  0x5d   :  { %1478 = dma.done.wait [#allocation9], 3072  }
  0x5e   :  { %1479 = vsyncadd [#allocation9], 4294964224 }
  0x5f   :  { %1480 = dma.done.wait [#allocation12], 640  }
  0x60   :  { %1481 = vsyncadd [#allocation12], 4294966656  ;;  %v110_v0 = vlaneseq  ;;  %v1495_v1 = vmov 0.0   ;;  %v1624_v5 = vld [vmem:[#allocation4] sm:$0xff]  ;;  %v1626_v6 = vld [vmem:[#allocation4 + $0x8] sm:$0xff]  ;;  %vm1496_vm2 = vmmov 0  }
  0x61   :  { %1201 = vmatprep.subr.bf16.mxu0 %v1495_v1  ;;  %1221 = vmatprep.subr.bf16.mxu1 %v1495_v1  ;;  %vm102_vm0 = vcmp.ne.s32.totalorder %v1624_v5, 0  ;;  %vm103_vm1 = vcmp.ne.s32.totalorder %v1626_v6, 0  ;;  %v1294_v24 = vld [vmem:[#allocation8] sm:$0xff]   ;;  %v1295_v27 = vld [vmem:[#allocation8 + $0x8] sm:$0xff]   ;;  %v1296_v29 = vld [vmem:[#allocation8 + $0x10] sm:$0xff]   ;;  %vm672_vm3 = vcmask 130048  }
  0x62   :  { %v1616_v2 = vshrl.u32 %v110_v0, 7  ;;  %v108_v8 = vsel %vm102_vm0, %v1624_v5, 4294967295  ;;  %v1639_v9 = vsel %vm103_vm1, %v1626_v6, 4294967295  ;;  %1202 = vmatpush3.bf16.msra.mxu0 %v1294_v24  ;;  %v1297_v32 = vld [vmem:[#allocation8 + $0x18] sm:$0xff]   ;;  %v1298_v34 = vld [vmem:[#allocation8 + $0x20] sm:$0xff]   ;;  %v1299_v36 = vld [vmem:[#allocation8 + $0x28] sm:$0xff]   ;;  %1217 = vmatprep.mubr.msk.bf16.mxu0 %vm1496_vm2, %v1495_v1 }
  0x63   :  { %1203 = vmatprep.subr.bf16.mxu0 %v1495_v1  ;;  %v1300_v37 = vld [vmem:[#allocation8 + $0x30] sm:$0xff]   ;;  %v1301_v38 = vld [vmem:[#allocation8 + $0x38] sm:$0xff]   ;;  %1237 = vmatprep.mubr.msk.bf16.mxu1 %vm1496_vm2, %v1495_v1  ;;  %v1302_v39 = vld [vmem:[#allocation10] sm:$0xff]   ;;  %v1104_v43 = vsel %vm102_vm0, 1.0, %v1495_v1  ;;  %v1105_v45 = vsel %vm103_vm1, 1.0, %v1495_v1  ;;  %v1685_v54 = vand.u32 127, %v110_v0 }
  0x64   :  { %v1619_v3 = vsub.s32 1, %v1616_v2  ;;  %v1622_v4 = vsub.s32 0, %v1616_v2  ;;  %v1629_v7 = vsub.s32 2, %v1616_v2  ;;  %v147_v14 = vsub.s32 3, %v1616_v2  ;;  %1222 = vmatpush3.bf16.msra.mxu1 %v1302_v39  ;;  %v1304_v40 = vld [vmem:[#allocation10 + $0x8] sm:$0xff]   ;;  %v1306_v41 = vld [vmem:[#allocation10 + $0x10] sm:$0xff]  }
  0x65   :  { %v158_v19 = vsub.s32 4, %v1616_v2  ;;  %v169_v22 = vsub.s32 5, %v1616_v2  ;;  %v180_v26 = vsub.s32 6, %v1616_v2  ;;  %v191_v31 = vsub.s32 7, %v1616_v2  ;;  %1223 = vmatprep.subr.bf16.mxu1 %v1495_v1  ;;  %v1308_v42 = vld [vmem:[#allocation10 + $0x18] sm:$0xff]   ;;  %v1310_v47 = vld [vmem:[#allocation10 + $0x20] sm:$0xff]  }
  0x66   :  { %v126_v10 = vrot.slane %v108_v8, %v1619_v3  ;;  %v115_v11 = vrot.slane %v108_v8, %v1622_v4  ;;  %v203_v12 = vrot.slane %v1639_v9, %v1622_v4  ;;  %v214_v13 = vrot.slane %v1639_v9, %v1619_v3  ;;  %1204 = vmatpush3.bf16.msra.mxu0 %v1295_v27  ;;  %v1312_v48 = vld [vmem:[#allocation10 + $0x28] sm:$0xff]   ;;  %v1314_v51 = vld [vmem:[#allocation10 + $0x30] sm:$0xff]  }
  0x67   :  { %v137_v15 = vrot.slane %v108_v8, %v1629_v7  ;;  %v225_v16 = vrot.slane %v1639_v9, %v1629_v7  ;;  %v148_v17 = vrot.slane %v108_v8, %v147_v14  ;;  %v236_v18 = vrot.slane %v1639_v9, %v147_v14  ;;  %1205 = vmatprep.subr.bf16.mxu0 %v1495_v1 }
  0x68   :  { %128 = vbcast.lane.b32.xlu1 %v126_v10, 256  ;;  %117 = vbcast.lane.b32.xlu0 %v115_v11, 256  ;;  %v159_v20 = vrot.slane %v108_v8, %v158_v19  ;;  %v247_v21 = vrot.slane %v1639_v9, %v158_v19  ;;  %v170_v23 = vrot.slane %v108_v8, %v169_v22  ;;  %v673_v44 = vsel %vm672_vm3, %v1104_v43, 0.0 }
  0x69   :  { %v258_v25 = vrot.slane %v1639_v9, %v169_v22  ;;  %v181_v28 = vrot.slane %v108_v8, %v180_v26  ;;  %v269_v30 = vrot.slane %v1639_v9, %v180_v26  ;;  %v192_v33 = vrot.slane %v108_v8, %v191_v31  ;;  %1224 = vmatpush3.bf16.msra.mxu1 %v1304_v40 }
  0x6a   :  { %1206 = vmatpush3.bf16.msra.mxu0 %v1296_v29  ;;  %v280_v35 = vrot.slane %v1639_v9, %v191_v31  ;;  %1225 = vmatprep.subr.bf16.mxu1 %v1495_v1  ;;  %v676_v46 = vsel %vm672_vm3, %v1105_v45, 0.0 }
  0x6b   :  { %1207 = vmatprep.subr.bf16.mxu0 %v1495_v1 }
  0x6c   :  { %132 = vbcast.lane.b32.xlu1 %v126_v10, 264  ;;  %121 = vbcast.lane.b32.xlu0 %v115_v11, 264 }
  0x6d   :  { %1226 = vmatpush3.bf16.msra.mxu1 %v1306_v41 }
  0x6e   :  { %1208 = vmatpush3.bf16.msra.mxu0 %v1297_v32  ;;  %1227 = vmatprep.subr.bf16.mxu1 %v1495_v1 }
  0x6f   :  { %1209 = vmatprep.subr.bf16.mxu0 %v1495_v1 }
  0x70   :  { %209 = vbcast.lane.b32.xlu1 %v203_v12, 264  ;;  %205 = vbcast.lane.b32.xlu0 %v203_v12, 256 }
  0x71   :  { %1228 = vmatpush3.bf16.msra.mxu1 %v1308_v42 }
  0x72   :  { %1210 = vmatpush3.bf16.msra.mxu0 %v1298_v34  ;;  %1229 = vmatprep.subr.bf16.mxu1 %v1495_v1 }
  0x73   :  { %1211 = vmatprep.subr.bf16.mxu0 %v1495_v1 }
  0x74   :  { %220 = vbcast.lane.b32.xlu1 %v214_v13, 264  ;;  %216 = vbcast.lane.b32.xlu0 %v214_v13, 256 }
  0x75   :  { %1230 = vmatpush3.bf16.msra.mxu1 %v1310_v47 }
  0x76   :  { %1212 = vmatpush3.bf16.msra.mxu0 %v1299_v36  ;;  %1231 = vmatprep.subr.bf16.mxu1 %v1495_v1 }
  0x77   :  { %1213 = vmatprep.subr.bf16.mxu0 %v1495_v1 }
  0x78   :  { %143 = vbcast.lane.b32.xlu1 %v137_v15, 264  ;;  %139 = vbcast.lane.b32.xlu0 %v137_v15, 256 }
  0x79   :  { %1232 = vmatpush3.bf16.msra.mxu1 %v1312_v48 }
  0x7a   :  { %1214 = vmatpush3.bf16.msra.mxu0 %v1300_v37  ;;  %1233 = vmatprep.subr.bf16.mxu1 %v1495_v1 }
  0x7b   :  { %1215 = vmatprep.subr.bf16.mxu0 %v1495_v1 }
  0x7c   :  { %231 = vbcast.lane.b32.xlu1 %v225_v16, 264  ;;  %227 = vbcast.lane.b32.xlu0 %v225_v16, 256 }
  0x7d   :  { %1234 = vmatpush3.bf16.msra.mxu1 %v1314_v51 }
  0x7e   :  { %1216 = vmatpush3.bf16.msra.mxu0 %v1301_v38  ;;  %1235 = vmatprep.subr.bf16.mxu1 %v1495_v1 }
  0x7f   :  { %1241 = vmatprep.subr.bf16.mxu0 %v1495_v1 }
  0x80   :  { %154 = vbcast.lane.b32.xlu1 %v148_v17, 264  ;;  %150 = vbcast.lane.b32.xlu0 %v148_v17, 256 }
  0x84   :  { %242 = vbcast.lane.b32.xlu1 %v236_v18, 264  ;;  %238 = vbcast.lane.b32.xlu0 %v236_v18, 256 }
  0x88   :  { %165 = vbcast.lane.b32.xlu1 %v159_v20, 264  ;;  %161 = vbcast.lane.b32.xlu0 %v159_v20, 256 }
  0x8c   :  { %253 = vbcast.lane.b32.xlu1 %v247_v21, 264  ;;  %249 = vbcast.lane.b32.xlu0 %v247_v21, 256 }
  0x90   :  { %176 = vbcast.lane.b32.xlu1 %v170_v23, 264  ;;  %172 = vbcast.lane.b32.xlu0 %v170_v23, 256 }
  0x94   :  { %264 = vbcast.lane.b32.xlu1 %v258_v25, 264  ;;  %260 = vbcast.lane.b32.xlu0 %v258_v25, 256 }
  0x98   :  { %187 = vbcast.lane.b32.xlu1 %v181_v28, 264  ;;  %183 = vbcast.lane.b32.xlu0 %v181_v28, 256 }
  0x9c   :  { %275 = vbcast.lane.b32.xlu1 %v269_v30, 264  ;;  %271 = vbcast.lane.b32.xlu0 %v269_v30, 256 }
  0xa0   :  { %198 = vbcast.lane.b32.xlu1 %v192_v33, 264  ;;  %194 = vbcast.lane.b32.xlu0 %v192_v33, 256 }
  0xa4   :  { %286 = vbcast.lane.b32.xlu1 %v280_v35, 264  ;;  %282 = vbcast.lane.b32.xlu0 %v280_v35, 256 }
  0xc3   :  { %674 = vadd.xlane.f32.xlu0 %v673_v44 }
  0xc8   :  { %677 = vadd.xlane.f32.xlu1 %v676_v46 }
  0xda   :  { %v129_v49 = vpop.permute.xlu1 %128  ;;  %v118_v50 = vpop.permute.xlu0 %117 }
  0xdb   :  { %vm290_vm6 = vcmp.eq.s32.totalorder %v129_v49, %v1685_v54  ;;  %vm288_vm7 = vcmp.eq.s32.totalorder %v118_v50, %v1685_v54 }
  0xdc   :  { %v1108_v59 = vsel %vm290_vm6, 1.0, %v1495_v1  ;;  %v1106_v62 = vsel %vm288_vm7, 1.0, %v1495_v1 }
  0xde   :  { %v133_v52 = vpop.permute.xlu1 %132  ;;  %v122_v53 = vpop.permute.xlu0 %121 }
  0xdf   :  { %vm291_vm4 = vcmp.eq.s32.totalorder %v133_v52, %v1685_v54  ;;  %vm289_vm5 = vcmp.eq.s32.totalorder %v122_v53, %v1685_v54 }
  0xe0   :  { %v1109_v57 = vsel %vm291_vm4, 1.0, %v1495_v1  ;;  %v1107_v58 = vsel %vm289_vm5, 1.0, %v1495_v1 }
  0xe1   :  { %v391_v63 = vadd.f32 %v1109_v57, %v1108_v59  ;;  %v384_v0 = vadd.f32 %v1107_v58, %v1106_v62 }
  0xe2   :  { %v210_v55 = vpop.permute.xlu1 %209  ;;  %v206_v56 = vpop.permute.xlu0 %205 }
  0xe3   :  { %v392_v8 = vrot.slane %v391_v63, 4  ;;  %vm305_vm8 = vcmp.eq.s32.totalorder %v210_v55, %v1685_v54  ;;  %vm304_vm9 = vcmp.eq.s32.totalorder %v206_v56, %v1685_v54  ;;  %v385_v9 = vrot.slane %v384_v0, 4 }
  0xe4   :  { %v1123_v10 = vsel %vm305_vm8, 1.0, %v1495_v1  ;;  %v1122_v11 = vsel %vm304_vm9, 1.0, %v1495_v1 }
  0xe5   :  { %v393_v14 = vadd.f32 %v392_v8, %v391_v63  ;;  %v386_v15 = vadd.f32 %v385_v9, %v384_v0  ;;  %v440_v16 = vadd.f32 %v1123_v10, %v1122_v11 }
  0xe6   :  { %v221_v60 = vpop.permute.xlu1 %220  ;;  %v217_v61 = vpop.permute.xlu0 %216 }
  0xe7   :  { %vm307_vm10 = vcmp.eq.s32.totalorder %v221_v60, %v1685_v54  ;;  %vm306_vm11 = vcmp.eq.s32.totalorder %v217_v61, %v1685_v54  ;;  %v394_v19 = vrot.slane %v393_v14, 2  ;;  %v387_v20 = vrot.slane %v386_v15, 2 }
  0xe8   :  { %v441_v21 = vrot.slane %v440_v16, 4  ;;  %v1125_v22 = vsel %vm307_vm10, 1.0, %v1495_v1  ;;  %v1124_v23 = vsel %vm306_vm11, 1.0, %v1495_v1 }
  0xe9   :  { %v395_v26 = vadd.f32 %v394_v19, %v393_v14  ;;  %v388_v27 = vadd.f32 %v387_v20, %v386_v15  ;;  %v447_v28 = vadd.f32 %v1125_v22, %v1124_v23 }
  0xea   :  { %v144_v5 = vpop.permute.xlu1 %143  ;;  %v140_v6 = vpop.permute.xlu0 %139  ;;  %v442_v29 = vadd.f32 %v441_v21, %v440_v16 }
  0xeb   :  { %vm293_vm12 = vcmp.eq.s32.totalorder %v144_v5, %v1685_v54  ;;  %vm292_vm13 = vcmp.eq.s32.totalorder %v140_v6, %v1685_v54  ;;  %v396_v34 = vrot.slane %v395_v26, 1  ;;  %v389_v35 = vrot.slane %v388_v27, 1 }
  0xec   :  { %v1111_v30 = vsel %vm293_vm12, 1.0, %v1495_v1  ;;  %v1110_v31 = vsel %vm292_vm13, 1.0, %v1495_v1  ;;  %v448_v36 = vrot.slane %v447_v28, 4  ;;  %v443_v37 = vrot.slane %v442_v29, 2 }
  0xed   :  { %v398_v38 = vadd.f32 %v1111_v30, %v1110_v31  ;;  %v397_v43 = vadd.f32 %v396_v34, %v395_v26  ;;  %v390_v58 = vadd.f32 %v389_v35, %v388_v27 }
  0xee   :  { %v232_v12 = vpop.permute.xlu1 %231  ;;  %v228_v13 = vpop.permute.xlu0 %227  ;;  %v449_v44 = vadd.f32 %v448_v36, %v447_v28  ;;  %v444_v63 = vadd.f32 %v443_v37, %v442_v29 }
  0xef   :  { %vm309_vm14 = vcmp.eq.s32.totalorder %v232_v12, %v1685_v54  ;;  %vm308_vm15 = vcmp.eq.s32.totalorder %v228_v13, %v1685_v54  ;;  %v399_v51 = vrot.slane %v398_v38, 4  ;;  %v497_v8 = vpack.c.bf16 %v397_v43, %v397_v43 }
  0xf0   :  { %v1127_v41 = vsel %vm309_vm14, 1.0, %v1495_v1  ;;  %v1126_v42 = vsel %vm308_vm15, 1.0, %v1495_v1  ;;  %v450_v60 = vrot.slane %v449_v44, 2  ;;  %v496_v14 = vpack.c.bf16 %v390_v58, %v390_v58 }
  0xf1   :  { %v454_v52 = vadd.f32 %v1127_v41, %v1126_v42  ;;  %v400_v9 = vadd.f32 %v399_v51, %v398_v38  ;;  %v445_v20 = vrot.slane %v444_v63, 1 }
  0xf2   :  { %v155_v17 = vpop.permute.xlu1 %154  ;;  %v151_v18 = vpop.permute.xlu0 %150  ;;  %v451_v16 = vadd.f32 %v450_v60, %v449_v44  ;;  %v1738_v30 = vunpack.c.l.b16 %v496_v14 }
  0xf3   :  { %vm295_vm0 = vcmp.eq.s32.totalorder %v155_v17, %v1685_v54  ;;  %vm294_vm1 = vcmp.eq.s32.totalorder %v151_v18, %v1685_v54  ;;  %v455_v10 = vrot.slane %v454_v52, 4 }
  0xf4   :  { %v1113_v45 = vsel %vm295_vm0, 1.0, %v1495_v1  ;;  %v1112_v46 = vsel %vm294_vm1, 1.0, %v1495_v1 }
  0xf5   :  { %v405_v59 = vadd.f32 %v1113_v45, %v1112_v46  ;;  %v456_v26 = vadd.f32 %v455_v10, %v454_v52 }
  0xf6   :  { %v243_v24 = vpop.permute.xlu1 %242  ;;  %v239_v25 = vpop.permute.xlu0 %238 }
  0xf7   :  { %vm311_vm3 = vcmp.eq.s32.totalorder %v243_v24, %v1685_v54  ;;  %vm310_vm4 = vcmp.eq.s32.totalorder %v239_v25, %v1685_v54  ;;  %v406_v15 = vrot.slane %v405_v59, 4  ;;  %v1736_v24 = vunpack.c.l.b16 %v497_v8 }
  0xf8   :  { %v1129_v47 = vsel %vm311_vm3, 1.0, %v1495_v1  ;;  %v1128_v48 = vsel %vm310_vm4, 1.0, %v1495_v1  ;;  %v401_v25 = vrot.slane %v400_v9, 2  ;;  %v457_v42 = vrot.slane %v456_v26, 2 }
  0xf9   :  { %v461_v61 = vadd.f32 %v1129_v47, %v1128_v48  ;;  %v407_v31 = vadd.f32 %v406_v15, %v405_v59 }
  0xfa   :  { %v166_v32 = vpop.permute.xlu1 %165  ;;  %v162_v33 = vpop.permute.xlu0 %161  ;;  %v402_v41 = vadd.f32 %v401_v25, %v400_v9  ;;  %v458_v58 = vadd.f32 %v457_v42, %v456_v26 }
  0xfb   :  { %vm297_vm5 = vcmp.eq.s32.totalorder %v166_v32, %v1685_v54  ;;  %vm296_vm6 = vcmp.eq.s32.totalorder %v162_v33, %v1685_v54  ;;  %v462_v17 = vrot.slane %v461_v61, 4  ;;  %v452_v32 = vrot.slane %v451_v16, 1 }
  0xfc   :  { %v1115_v49 = vsel %vm297_vm5, 1.0, %v1495_v1  ;;  %v1114_v50 = vsel %vm296_vm6, 1.0, %v1495_v1  ;;  %v408_v46 = vrot.slane %v407_v31, 2  ;;  %v459_v14 = vrot.slane %v458_v58, 1 }
  0xfd   :  { %v412_v62 = vadd.f32 %v1115_v49, %v1114_v50  ;;  %v463_v33 = vadd.f32 %v462_v17, %v461_v61  ;;  %v1748_v48 = vadd.f32 %v452_v32, %v451_v16  ;;  %vm560_vm6 = vcmask 1041409  }
  0xfe   :  { %v254_v39 = vpop.permute.xlu1 %253  ;;  %v250_v40 = vpop.permute.xlu0 %249 }
  0xff   :  { %vm313_vm7 = vcmp.eq.s32.totalorder %v254_v39, %v1685_v54  ;;  %vm312_vm8 = vcmp.eq.s32.totalorder %v250_v40, %v1685_v54  ;;  %v413_v18 = vrot.slane %v412_v62, 4  ;;  %v1744_v40 = vadd.f32 %v445_v20, %v444_v63 }
 0x100   :  { %v1131_v53 = vsel %vm313_vm7, 1.0, %v1495_v1  ;;  %v1130_v55 = vsel %vm312_vm8, 1.0, %v1495_v1  ;;  %v464_v49 = vrot.slane %v463_v33, 2  ;;  %v409_v63 = vadd.f32 %v408_v46, %v407_v31 }
 0x101   :  { %v468_v0 = vadd.f32 %v1131_v53, %v1130_v55  ;;  %v414_v34 = vadd.f32 %v413_v18, %v412_v62  ;;  %vm562_vm7 = vcmask 1042434   ;;  %v504_v46 = vpack.c.bf16 %v1744_v40, %v1744_v40 }
 0x102   :  { %v177_v56 = vpop.permute.xlu1 %176  ;;  %v173_v57 = vpop.permute.xlu0 %172  ;;  %v410_v20 = vrot.slane %v409_v63, 1  ;;  %vm564_vm8 = vcmask 1043459  }
 0x103   :  { %vm299_vm9 = vcmp.eq.s32.totalorder %v177_v56, %v1685_v54  ;;  %vm298_vm10 = vcmp.eq.s32.totalorder %v173_v57, %v1685_v54  ;;  %v469_v21 = vrot.slane %v468_v0, 4  ;;  %v415_v50 = vrot.slane %v414_v34, 2 }
 0x104   :  { %v1117_v5 = vsel %vm299_vm9, 1.0, %v1495_v1  ;;  %v1116_v6 = vsel %vm298_vm10, 1.0, %v1495_v1  ;;  %v403_v57 = vrot.slane %v402_v41, 1  ;;  %vm566_vm9 = vcmask 1044484  }
 0x105   :  { %v419_v11 = vadd.f32 %v1117_v5, %v1116_v6  ;;  %v470_v36 = vadd.f32 %v469_v21, %v468_v0  ;;  %v465_v5 = vadd.f32 %v464_v49, %v463_v33  ;;  %v416_v6 = vadd.f32 %v415_v50, %v414_v34 }
 0x106   :  { %v265_v12 = vpop.permute.xlu1 %264  ;;  %v261_v13 = vpop.permute.xlu0 %260  ;;  %vm568_vm10 = vcmask 1045509  }
 0x107   :  { %vm315_vm11 = vcmp.eq.s32.totalorder %v265_v12, %v1685_v54  ;;  %vm314_vm12 = vcmp.eq.s32.totalorder %v261_v13, %v1685_v54  ;;  %v420_v22 = vrot.slane %v419_v11, 4  ;;  %v471_v52 = vrot.slane %v470_v36, 2 }
 0x108   :  { %v1133_v19 = vsel %vm315_vm11, 1.0, %v1495_v1  ;;  %v1132_v23 = vsel %vm314_vm12, 1.0, %v1495_v1  ;;  %vm570_vm11 = vcmask 1046534   ;;  %vm572_vm12 = vcmask 1047559  }
 0x109   :  { %v475_v27 = vadd.f32 %v1133_v19, %v1132_v23  ;;  %v421_v37 = vadd.f32 %v420_v22, %v419_v11  ;;  %v472_v10 = vadd.f32 %v471_v52, %v470_v36  ;;  %v466_v22 = vrot.slane %v465_v5, 1 }
 0x10a   :  { %v188_v28 = vpop.permute.xlu1 %187  ;;  %v184_v29 = vpop.permute.xlu0 %183  ;;  %v404_v36 = vadd.f32 %v403_v57, %v402_v41 }
 0x10b   :  { %vm301_vm13 = vcmp.eq.s32.totalorder %v188_v28, %v1685_v54  ;;  %vm300_vm14 = vcmp.eq.s32.totalorder %v184_v29, %v1685_v54  ;;  %v476_v35 = vrot.slane %v475_v27, 4  ;;  %v422_v53 = vrot.slane %v421_v37, 2 }
 0x10c   :  { %v1119_v38 = vsel %vm301_vm13, 1.0, %v1495_v1  ;;  %v1118_v39 = vsel %vm300_vm14, 1.0, %v1495_v1  ;;  %v473_v28 = vrot.slane %v472_v10, 1  ;;  %v467_v42 = vadd.f32 %v466_v22, %v465_v5 }
 0x10d   :  { %v477_v43 = vadd.f32 %v476_v35, %v475_v27  ;;  %v426_v47 = vadd.f32 %v1119_v38, %v1118_v39  ;;  %v423_v11 = vadd.f32 %v422_v53, %v421_v37  ;;  %v417_v27 = vrot.slane %v416_v6, 1 }
 0x10e   :  { %v276_v44 = vpop.permute.xlu1 %275  ;;  %v272_v45 = vpop.permute.xlu0 %271  ;;  %v460_v37 = vadd.f32 %v459_v14, %v458_v58  ;;  %v411_v38 = vadd.f32 %v410_v20, %v409_v63  ;;  %v474_v50 = vadd.f32 %v473_v28, %v472_v10  ;;  %vm943_vm13 = vcmask 523264  }
 0x10f   :  { %vm317_vm15 = vcmp.eq.s32.totalorder %v276_v44, %v1685_v54  ;;  %vm316_vm0 = vcmp.eq.s32.totalorder %v272_v45, %v1685_v54  ;;  %v427_v55 = vrot.slane %v426_v47, 4  ;;  %v478_v59 = vrot.slane %v477_v43, 2 }
 0x110   :  { %v1135_v51 = vsel %vm317_vm15, 1.0, %v1495_v1  ;;  %v1134_v56 = vsel %vm316_vm0, 1.0, %v1495_v1  ;;  %v424_v29 = vrot.slane %v423_v11, 1  ;;  %v418_v49 = vadd.f32 %v417_v27, %v416_v6 }
 0x111   :  { %v482_v60 = vadd.f32 %v1135_v51, %v1134_v56  ;;  %v428_v0 = vadd.f32 %v427_v55, %v426_v47  ;;  %v479_v15 = vadd.f32 %v478_v59, %v477_v43  ;;  %v505_v47 = vpack.c.bf16 %v1748_v48, %v1748_v48 }
 0x112   :  { %v199_v61 = vpop.permute.xlu1 %198  ;;  %v195_v62 = vpop.permute.xlu0 %194  ;;  %v425_v51 = vadd.f32 %v424_v29, %v423_v11  ;;  %v498_v55 = vpack.c.bf16 %v404_v36, %v404_v36  ;;  %v506_v56 = vpack.c.bf16 %v460_v37, %v460_v37  ;;  %v499_v59 = vpack.c.bf16 %v411_v38, %v411_v38 }
 0x113   :  { %vm303_vm1 = vcmp.eq.s32.totalorder %v199_v61, %v1685_v54  ;;  %vm302_vm3 = vcmp.eq.s32.totalorder %v195_v62, %v1685_v54  ;;  %v483_v8 = vrot.slane %v482_v60, 4  ;;  %v429_v12 = vrot.slane %v428_v0, 2 }
 0x114   :  { %v1121_v9 = vsel %vm303_vm1, 1.0, %v1495_v1  ;;  %v1120_v13 = vsel %vm302_vm3, 1.0, %v1495_v1  ;;  %v480_v32 = vrot.slane %v479_v15, 1  ;;  %v552_v62 = vunpack.c.l.b16 %v504_v46  ;;  %v1305_v46 = vld [vmem:[#allocation10 + $0x48] sm:$0xff]  }
 0x115   :  { %v484_v16 = vadd.f32 %v483_v8, %v482_v60  ;;  %v433_v17 = vadd.f32 %v1121_v9, %v1120_v13  ;;  %v430_v21 = vadd.f32 %v429_v12, %v428_v0  ;;  %v507_v60 = vpack.c.bf16 %v467_v42, %v467_v42 }
 0x116   :  { %v287_v18 = vpop.permute.xlu1 %286  ;;  %v283_v19 = vpop.permute.xlu0 %282  ;;  %v481_v52 = vadd.f32 %v480_v32, %v479_v15  ;;  %v553_v63 = vunpack.c.l.b16 %v505_v47  ;;  %v500_v48 = vpack.c.bf16 %v418_v49, %v418_v49  ;;  %v508_v0 = vpack.c.bf16 %v474_v50, %v474_v50  ;;  %v1307_v47 = vld [vmem:[#allocation10 + $0x50] sm:$0xff]   ;;  %v1309_v49 = vld [vmem:[#allocation10 + $0x58] sm:$0xff]   ;;  %v1311_v50 = vld [vmem:[#allocation10 + $0x60] sm:$0xff]  }
 0x117   :  { %vm319_vm4 = vcmp.eq.s32.totalorder %v287_v18, %v1685_v54  ;;  %vm318_vm5 = vcmp.eq.s32.totalorder %v283_v19, %v1685_v54  ;;  %v485_v23 = vrot.slane %v484_v16, 2  ;;  %v434_v25 = vrot.slane %v433_v17, 4 }
 0x118   :  { %v1137_v26 = vsel %vm319_vm4, 1.0, %v1495_v1  ;;  %v1136_v31 = vsel %vm318_vm5, 1.0, %v1495_v1  ;;  %v431_v39 = vrot.slane %v430_v21, 1  ;;  %v501_v5 = vpack.c.bf16 %v425_v51, %v425_v51  ;;  %v1313_v51 = vld [vmem:[#allocation10 + $0x68] sm:$0xff]  }
 0x119   :  { %v486_v33 = vadd.f32 %v485_v23, %v484_v16  ;;  %v435_v34 = vadd.f32 %v434_v25, %v433_v17  ;;  %v489_v35 = vadd.f32 %v1137_v26, %v1136_v31  ;;  %v509_v6 = vpack.c.bf16 %v481_v52, %v481_v52  ;;  %v1315_v52 = vld [vmem:[#allocation10 + $0x70] sm:$0xff]  }
 0x11a   :  { %v432_v57 = vadd.f32 %v431_v39, %v430_v21  ;;  %v546_v10 = vunpack.c.l.b16 %v498_v55  ;;  %v554_v11 = vunpack.c.l.b16 %v506_v56  ;;  %v547_v14 = vunpack.c.l.b16 %v499_v59 }
 0x11b   :  { %v487_v43 = vrot.slane %v486_v33, 1  ;;  %v436_v44 = vrot.slane %v435_v34, 2  ;;  %v490_v45 = vrot.slane %v489_v35, 4  ;;  %v555_v15 = vunpack.c.l.b16 %v507_v60 }
 0x11c   :  { %v502_v12 = vpack.c.bf16 %v432_v57, %v432_v57  ;;  %v561_v18 = vsel %vm560_vm6, %v1736_v24, %v1738_v30  ;;  %v548_v19 = vunpack.c.l.b16 %v500_v48  ;;  %v556_v20 = vunpack.c.l.b16 %v508_v0  ;;  %v1318_v48 = vld [vmem:[#allocation11] sm:$0xff]  }
 0x11d   :  { %v437_v41 = vadd.f32 %v436_v44, %v435_v34  ;;  %v491_v53 = vadd.f32 %v490_v45, %v489_v35  ;;  %v488_v58 = vadd.f32 %v487_v43, %v486_v33  ;;  %v574_v21 = vsel %vm560_vm6, %v553_v63, %v552_v62  ;;  %v1303_v44 = vld [vmem:[#allocation10 + $0x40] sm:$0xff]  }
 0x11e   :  { %v549_v22 = vunpack.c.l.b16 %v501_v5  ;;  %v557_v23 = vunpack.c.l.b16 %v509_v6  ;;  %v563_v26 = vsel %vm562_vm7, %v546_v10, %v561_v18  ;;  %v575_v27 = vsel %vm562_vm7, %v554_v11, %v574_v21  ;;  %v1320_v10 = vld [vmem:[#allocation11 + $0x10] sm:$0xff]   ;;  %v1321_v11 = vld [vmem:[#allocation11 + $0x18] sm:$0xff]  }
 0x11f   :  { %v438_v61 = vrot.slane %v437_v41, 1  ;;  %v492_v40 = vrot.slane %v491_v53, 2  ;;  %v510_v13 = vpack.c.bf16 %v488_v58, %v488_v58  ;;  %v550_v28 = vunpack.c.l.b16 %v502_v12  ;;  %v905_v12 = vld [vmem:[#allocation13] sm:$0xff] }
 0x120   :  { %v565_v33 = vsel %vm564_vm8, %v547_v14, %v563_v26  ;;  %v576_v24 = vsel %vm564_vm8, %v555_v15, %v575_v27  ;;  %v685_v14 = vld [vmem:[%s1833_s5] sm:$0x7]  ;;  %vm1049_vm14 = vcmp.eq.s32.totalorder %v1616_v2, %v1685_v54  ;;  %vm1055_vm15 = vcmask 7168   ;;  %s1497_s5 = smov [#allocation14]  }
 0x121   :  { %v439_v8 = vadd.f32 %v438_v61, %v437_v41  ;;  %v493_v9 = vadd.f32 %v492_v40, %v491_v53  ;;  %v558_v29 = vunpack.c.l.b16 %v510_v13  ;;  %v567_v30 = vsel %vm566_vm9, %v548_v19, %v565_v33  ;;  %v1316_v41 = vld [vmem:[#allocation10 + $0x38] sm:$0xff]   ;;  %s1077_s16 = sshll.u32 %s1497_s5, 4  ;;  %s1078_s16 = int_to_ptr.vmem [resolvable:$true] %s1077_s16 }
 0x122   :  { %v577_v34 = vsel %vm566_vm9, %v556_v20, %v576_v24  ;;  %v569_v36 = vsel %vm568_vm10, %v549_v22, %v567_v30  ;;  %1236 = vmatpush3.bf16.msra.mxu1 %v1316_v41  ;;  %v1317_v53 = vld [vmem:[#allocation10 + $0x78] sm:$0xff]   ;;  %v906_v13 = vpack.c.bf16 %v905_v12, %v905_v12  ;;  %v816_v15 = vrot.slane %v685_v14, %v1619_v3  ;;  %s1444_s25 = scalar_lea.vmem %s1078_s16, 128  ;;  %p1449_p3 = scmp.lt.s32.totalorder %s1078_s16, %s1078_s16 }
 0x123   :  { %v503_v16 = vpack.c.bf16 %v439_v8, %v439_v8  ;;  %v494_v17 = vrot.slane %v493_v9, 1  ;;  %v578_v37 = vsel %vm568_vm10, %v557_v23, %v577_v34  ;;  %v571_v38 = vsel %vm570_vm11, %v550_v28, %v569_v36  ;;  %1261 = vmatprep.subr.bf16.mxu1 %v1495_v1  ;;  %p1445_p2 = scmp.ne.s32.totalorder %s1078_s16, %s1444_s25  ;;  %p1450_p4 = scmp.lt.s32.totalorder %s1444_s25, %s1444_s25 }
 0x124   :  { %v579_v39 = vsel %vm570_vm11, %v558_v29, %v578_v37  ;;  %v706_v27 = vrot.slane %v685_v14, %v1622_v4 }
 0x125   :  { %v495_v25 = vadd.f32 %v494_v17, %v493_v9  ;;  %v551_v32 = vunpack.c.l.b16 %v503_v16  ;;  %v1319_v9 = vld [vmem:[#allocation11 + $0x8] sm:$0xff]   ;;  %p1451_p5 = por %p1450_p4, %p1449_p3 }
 0x127   :  { %v511_v31 = vpack.c.bf16 %v495_v25, %v495_v25  ;;  %v573_v42 = vsel %vm572_vm12, %v551_v32, %v571_v38  ;;  %p1452_p6 = pnand %p1451_p5, %p1445_p2 }
 0x129   :  { %v559_v35 = vunpack.c.l.b16 %v511_v31 }
 0x12b   :  { %v580_v43 = vsel %vm572_vm12, %v559_v35, %v579_v39 }
 0x12c   :  { %v581_v45 = vpack.c.b16 %v580_v43, %v573_v42 }
 0x12e   :  { %1218 = vmatmul.mubr.bf16.vlgmr.msra.gmra.mrb[0].mxu0 %v581_v45 }
 0x12f   :  { %1242 = vmatpush3.bf16.msra.mxu0 %v1303_v44  ;;  %1257 = vmatprep.mubr.msk.bf16.mxu0 %vm1496_vm2, %v1495_v1 }
 0x130   :  { %1243 = vmatprep.subr.bf16.mxu0 %v1495_v1 }
 0x133   :  { %1244 = vmatpush3.bf16.msra.mxu0 %v1305_v46 }
 0x134   :  { %1245 = vmatprep.subr.bf16.mxu0 %v1495_v1 }
 0x137   :  { %1246 = vmatpush3.bf16.msra.mxu0 %v1307_v47 }
 0x138   :  { %1247 = vmatprep.subr.bf16.mxu0 %v1495_v1 }
 0x13b   :  { %1248 = vmatpush3.bf16.msra.mxu0 %v1309_v49 }
 0x13c   :  { %1249 = vmatprep.subr.bf16.mxu0 %v1495_v1 }
 0x13f   :  { %1250 = vmatpush3.bf16.msra.mxu0 %v1311_v50 }
 0x140   :  { %1251 = vmatprep.subr.bf16.mxu0 %v1495_v1 }
 0x143   :  { %1252 = vmatpush3.bf16.msra.mxu0 %v1313_v51 }
 0x144   :  { %1253 = vmatprep.subr.bf16.mxu0 %v1495_v1 }
 0x147   :  { %1254 = vmatpush3.bf16.msra.mxu0 %v1315_v52 }
 0x148   :  { %1255 = vmatprep.subr.bf16.mxu0 %v1495_v1 }
 0x14b   :  { %1256 = vmatpush3.bf16.msra.mxu0 %v1317_v53 }
 0x150   :  { %v675_v55 = vpop.xlane.xlu0 %674 }
 0x151   :  { %v679_v57 = vmax.f32 %v675_v55, 1.0 }
 0x153   :  { %1322 = vrcp.f32 %v679_v57 }
 0x155   :  { %v678_v56 = vpop.xlane.xlu1 %677 }
 0x156   :  { %v680_v58 = vmax.f32 %v678_v56, 1.0 }
 0x158   :  { %1324 = vrcp.f32 %v680_v58 }
 0x15d   :  { %v1323_v59 = vpop.eup %1322 }
 0x162   :  { %v1325_v60 = vpop.eup %1324 }
 0x201   :  { %v665_v61 = vpop.f32.mrb[0].mxu0 }
 0x202   :  { %v682_v40 = vmul.f32 %v1323_v59, %v665_v61  ;;  %v1219_v62 = vpop.f32.mrb[1].mxu0 }
 0x203   :  { %v668_v63 = vpop.f32.mrb[2].mxu0 }
 0x204   :  { %v686_v0 = vpack.c.bf16 %v682_v40, %v682_v40  ;;  %v684_v5 = vmul.f32 %v1325_v60, %v668_v63  ;;  %v1220_v6 = vpop.f32.mrb[3].mxu0 }
 0x206   :  { %v795_v8 = vpack.c.bf16 %v684_v5, %v684_v5  ;;  %1238 = vmatmul.mubr.bf16.vlgmr.msra.gmra.mrb[0].mxu1 %v686_v0 }
 0x207   :  { %1262 = vmatpush3.bf16.msra.mxu1 %v1318_v48  ;;  %1269 = vmatprep.mubr.msk.bf16.mxu1 %vm1496_vm2, %v1495_v1 }
 0x208   :  { %1258 = vmatmul.mubr.bf16.vlgmr.msra.gmra.mrb[4].mxu0 %v795_v8  ;;  %1263 = vmatprep.subr.bf16.mxu1 %v1495_v1 }
 0x20b   :  { %1264 = vmatpush3.bf16.msra.mxu1 %v1319_v9 }
 0x20c   :  { %1265 = vmatprep.subr.bf16.mxu1 %v1495_v1 }
 0x20f   :  { %1266 = vmatpush3.bf16.msra.mxu1 %v1320_v10 }
 0x210   :  { %1267 = vmatprep.subr.bf16.mxu1 %v1495_v1 }
 0x213   :  { %1268 = vmatpush3.bf16.msra.mxu1 %v1321_v11 }
 0x214   :  { %1273 = vmatprep.subr.bf16.mxu1 %v1495_v1 }
 0x216   :  { %1270 = vmatmul.mubr.msk.bf16.vlgmr.msra.gmra.mrb[4].mxu1 %vm943_vm13, %v906_v13 }
 0x217   :  { %1275 = vmatprep.mubr.msk.bf16.mxu1 %vm1496_vm2, %v1495_v1  ;;  %v918_v1 = vrot.slane %v685_v14, %v1629_v7  ;;  %vm1033_vm2 = vcmask 64512  }
 0x2d9   :  { %v789_v16 = vpop.f32.mrb[0].mxu1 }
 0x2da   :  { %v1239_v17 = vpop.f32.mrb[1].mxu1  ;;  %v790_v29 = vadd.f32 %v789_v16, %v706_v27 }
 0x2db   :  { %v792_v18 = vpop.f32.mrb[2].mxu1  ;;  %v899_v19 = vpop.f32.mrb[4].mxu0 }
 0x2dc   :  { %v900_v20 = vadd.f32 %v899_v19, %v816_v15  ;;  %v1240_v21 = vpop.f32.mrb[3].mxu1  ;;  %v1259_v22 = vpop.f32.mrb[5].mxu0 }
 0x2dd   :  { %v902_v23 = vpop.f32.mrb[6].mxu0 }
 0x2de   :  { %v988_v25 = vpack.c.bf16 %v900_v20, %v900_v20  ;;  %v1260_v26 = vpop.f32.mrb[7].mxu0 }
 0x2e0   :  { %1274 = vmatpush3.bf16.xpose.msra.mxu1 %v988_v25 }
 0x2e9   :  { %v981_v28 = vpop.f32.mrb[4].mxu1 }
 0x2ea   :  { %v982_v31 = vadd.f32 %v981_v28, %v918_v1  ;;  %v1271_v32 = vpop.f32.mrb[5].mxu1 }
 0x2eb   :  { %v984_v3 = vpop.f32.mrb[6].mxu1 }
 0x2ec   :  { %v987_v33 = vpack.c.bf16 %v982_v31, %v790_v29  ;;  %v1272_v24 = vpop.f32.mrb[7].mxu1 }
 0x2ee   :  { %1276 = vmatmul.mubr.bf16.vlgmr.msra.gmra.mrb[8].mxu1 %v987_v33 }
 0x3c1   :  { %v1023_v30 = vpop.f32.mrb[8].mxu1 }
 0x3c2   :  { %v1277_v34 = vpop.f32.mrb[9].mxu1 }
 0x3c3   :  { %v1026_v35 = vpop.f32.mrb[10].mxu1 }
 0x3c4   :  { %1326 = vtanh.f32 %v1026_v35  ;;  %v1278_v36 = vpop.f32.mrb[11].mxu1 }
 0x3ce   :  { %v1327_v37 = vpop.eup %1326 }
 0x3cf   :  { %v1031_v38 = vmul.f32 0.5, %v1327_v37 }
 0x3d1   :  { %v1032_v4 = vadd.f32 %v1031_v38, %v1023_v30 }
 0x3d3   :  { %v1035_v7 = vsel %vm1033_vm2, %v1032_v4, -inf  ;;  %1034 = vst.msk [vmem:[#allocation14] sm:$0xff] %vm1033_vm2, %v1032_v4  ;;  %v1050_v39 = vsel %vm1049_vm14, %v1032_v4, 0.0 }
 0x3d4   :  { %1036 = vmax.xlane.f32.xlu0 %v1035_v7  ;;  %v1051_v42 = vsel %vm1033_vm2, %v1050_v39, 0.0 }
 0x3d5   :  { %1052 = vadd.xlane.f32.xlu1 %v1051_v42 }
 0x461   :  { %v1037_v43 = vpop.xlane.xlu0 %1036 }
 0x462   :  { %v1038_v44 = vsub.f32 %v1032_v4, %v1037_v43  ;;  %v1053_v2 = vpop.xlane.xlu1 %1052 }
 0x464   :  { %v1039_v45 = vmul.f32 1.442695, %v1038_v44 }
 0x466   :  { %1328 = vpow2.f32 %v1039_v45 }
 0x470   :  { %v1329_v46 = vpop.eup %1328 }
 0x471   :  { %v1041_v47 = vsel %vm1033_vm2, %v1329_v46, 0.0 }
 0x472   :  { %1042 = vadd.xlane.f32.xlu0 %v1041_v47 }
 0x4ff   :  { %v1043_v49 = vpop.xlane.xlu0 %1042 }
 0x500   :  { %1330 = vlog2.f32 %v1043_v49 }
 0x50a   :  { %v1331_v50 = vpop.eup %1330 }
 0x50b   :  { %v1045_v51 = vmul.f32 0.6931472, %v1331_v50 }
 0x50d   :  { %v1046_v52 = vadd.f32 %v1045_v51, %v1037_v43 }
 0x50f   :  { %v1054_v54 = vsub.f32 %v1046_v52, %v1053_v2 }
 0x511   :  { %v1056_v41 = vsel %vm1055_vm15, %v1054_v54, 0.0 }
 0x512   :  { %1057 = vadd.xlane.f32.xlu0 %v1056_v41 }
 0x513   :  { %1455 = shalt.err (!%p1452_p6)
}
 0x514   :  { %s1456_s30 = scalar_lea.hbm %s1835_s7, 128 }
 0x515   :  { %p1457_p7 = scmp.ne.s32.totalorder %s1835_s7, %s1456_s30  ;;  %p1460_p8 = scmp.lt.u32.totalorder %s1456_s30, %s1835_s7 }
 0x517   :  { %p1462_p9 = pnand %p1460_p8, %p1457_p7 }
 0x519   :  { %1465 = shalt.err (!%p1462_p9)
}
 0x51a   :  { %1080 = dma.vmem_to_hbm [thread:$0]  %s1078_s16, 128, %s1835_s7, [#allocation6]  }
 0x51b   :  { %s1466_s14 = scalar_lea.hbm %s1836_s8, 16 }
 0x51c   :  { %p1467_p10 = scmp.ne.s32.totalorder %s1836_s8, %s1466_s14  ;;  %p1470_p11 = scmp.lt.u32.totalorder %s1466_s14, %s1836_s8 }
 0x51e   :  { %p1472_p12 = pnand %p1470_p11, %p1467_p10 }
 0x59f   :  { %v1058_v53 = vpop.xlane.xlu0 %1057 }
 0x5a0   :  { %v1059_v55 = vrot.slane %v1058_v53, 4 }
 0x5a2   :  { %v1060_v56 = vadd.f32 %v1059_v55, %v1058_v53 }
 0x5a4   :  { %v1061_v57 = vrot.slane %v1060_v56, 2 }
 0x5a6   :  { %v1062_v58 = vadd.f32 %v1061_v57, %v1060_v56 }
 0x5a8   :  { %v1063_v59 = vrot.slane %v1062_v58, 1 }
 0x5aa   :  { %v1064_v60 = vadd.f32 %v1063_v59, %v1062_v58 }
 0x5ac   :  { %1279 = vpush %v1064_v60 }
 0x5dd   :  { %s1280_s1 = spop %1279 }
 0x5de   :  { %s1068_s0 = smul.f32 0.125, %s1280_s1 }
 0x5e0   :  { %1070 = sst [smem:[#allocation15]] %s1068_s0 }
 0x5e1   :  { %1475 = shalt.err (!%p1472_p12)
}
 0x5e2   :  { %s1498_s4 = smov [#allocation15]  }
 0x5e3   :  { %1088 = dma.smem_to_hbm %s1498_s4, 16, %s1836_s8, [#allocation7]  }
 0x5e4   :  { %1482 = dma.done.wait [#allocation6], 128  }
 0x5e5   :  { %1483 = vsyncadd [#allocation6], 4294967168 }
 0x5e6   :  { %1484 = dma.done.wait [#allocation7], 16  }
 0x5e7   :  { %1485 = vsyncadd [#allocation7], 4294967280 }
 0x5e8   :  { %1095 = sfence }
 0x5e9   :  { %1096 = vsyncpa [#allocation5], 1 }
 0x5ea   :  { %1097 = vsyncpa [#allocation9], 1 }
 0x5eb   :  { %1098 = vsyncpa [#allocation12], 1 }
 0x5ec   :  { %1099 = vsyncpa [#allocation6], 1 }
 0x5ed   :  { %1100 = vsyncpa [#allocation7], 1 }

</bundles_post_ra>
